<compile_context>
chip_gen: v7x
topology: tpu7x:2x2x1
jax: 0.10.0
libtpu: 0.0.40
codegen_flags: <defaults>
</compile_context>

<pallas_src>
import math

import jax
import jax.numpy as jnp
from jax.experimental import pallas as pl
from jax.experimental.pallas import tpu as pltpu


_INV_SQRT2 = 1.0 / math.sqrt(2.0)


def _erf_poly(x):
    """erf(x) via Abramowitz & Stegun 7.1.26 (|error| <= 1.5e-7), f32 in/out.

    Uses only abs / exp / div / where so it lowers on every Pallas TPU target.
    """
    ax = jnp.abs(x)
    t = 1.0 / (1.0 + 0.3275911 * ax)
    poly = ((((1.061405429 * t - 1.453152027) * t + 1.421413741) * t
             - 0.284496736) * t + 0.254829592) * t
    erf_abs = 1.0 - poly * jnp.exp(-ax * ax)
    return jnp.where(x < 0.0, -erf_abs, erf_abs)


def _gelu_exact(h):
    # exact (erf-based) GELU, matching torch.nn.GELU() default; h is f32
    return 0.5 * h * (1.0 + _erf_poly(h * _INV_SQRT2))


def _adapter_kernel(a_ref, r_ref, w1_ref, b1_ref, w2_ref, b2_ref, scale_ref, o_ref):
    """o = r + scale * (gelu(a @ W1 + b1) @ W2 + b2) for one row-tile."""
    a = a_ref[...]                                     # native dtype straight to MXU
    h = jnp.dot(a, w1_ref[...], preferred_element_type=jnp.float32)
    h = _gelu_exact(h + b1_ref[...].astype(jnp.float32))
    y = jnp.dot(h.astype(w2_ref.dtype), w2_ref[...],
                preferred_element_type=jnp.float32)
    y = y + b2_ref[...].astype(jnp.float32)
    o_ref[...] = (r_ref[...].astype(jnp.float32) + scale_ref[0] * y).astype(o_ref.dtype)


def _adapter_kernel_shared(a_ref, w1_ref, b1_ref, w2_ref, b2_ref, scale_ref, o_ref):
    """'before' mode: residual is the same tile as the matmul input (x read once)."""
    a = a_ref[...]
    h = jnp.dot(a, w1_ref[...], preferred_element_type=jnp.float32)
    h = _gelu_exact(h + b1_ref[...].astype(jnp.float32))
    y = jnp.dot(h.astype(w2_ref.dtype), w2_ref[...],
                preferred_element_type=jnp.float32)
    y = y + b2_ref[...].astype(jnp.float32)
    o_ref[...] = (a.astype(jnp.float32) + scale_ref[0] * y).astype(o_ref.dtype)


def _round_up(x, m):
    return (x + m - 1) // m * m


def _adapter_pallas(a, r, w1, b1, w2, b2, scale, *, tile_m=256):
    """a: [M, D]; r: [M, D] or None (residual == a). Returns r + scale*mlp(a), [M, D]."""
    M, D = a.shape
    D_pad, H_pad = w1.shape              # params are pre-padded to 128-multiples
    shared = r is None

    # lane-pad activations to the (128-multiple) padded embed dim
    if D_pad != D:
        a = jnp.pad(a, ((0, 0), (0, D_pad - D)))
        if not shared:
            r = jnp.pad(r, ((0, 0), (0, D_pad - D)))

    # row tile: large by default; shrink for tiny inputs, pad M to a multiple
    sub = 16 if jnp.dtype(a.dtype).itemsize < 4 else 8
    tm = min(tile_m, _round_up(M, sub))
    M_pad = _round_up(M, tm)
    if M_pad != M:
        a = jnp.pad(a, ((0, M_pad - M), (0, 0)))
        if not shared:
            r = jnp.pad(r, ((0, M_pad - M), (0, 0)))

    grid = (M_pad // tm,)
    row_spec = pl.BlockSpec((tm, D_pad), lambda i: (i, 0))
    # weight blocks have a constant index_map -> fetched once, kept resident
    weight_specs = [
        pl.BlockSpec((D_pad, H_pad), lambda i: (0, 0)),        # W1
        pl.BlockSpec((1, H_pad), lambda i: (0, 0)),            # b1
        pl.BlockSpec((H_pad, D_pad), lambda i: (0, 0)),        # W2
        pl.BlockSpec((1, D_pad), lambda i: (0, 0)),            # b2
        pl.BlockSpec(memory_space=pltpu.MemorySpace.SMEM),     # scale (scalar)
    ]
    if shared:
        kernel = _adapter_kernel_shared
        in_specs = [row_spec] + weight_specs
        args = (a, w1, b1, w2, b2, scale)
        n_row_arrays = 2                 # a tile + out tile
    else:
        kernel = _adapter_kernel
        in_specs = [row_spec, row_spec] + weight_specs
        args = (a, r, w1, b1, w2, b2, scale)
        n_row_arrays = 3                 # a + r + out

    act_bytes = jnp.dtype(a.dtype).itemsize
    w_bytes = jnp.dtype(w1.dtype).itemsize

    # VMEM budget (double-buffered row tiles + resident weights + f32 temps);
    # clamp to 64 MiB so the same config stays valid on v7x's smaller VMEM.
    vmem_needed = (2 * n_row_arrays * tm * D_pad * act_bytes
                   + 2 * (2 * D_pad * H_pad + H_pad + D_pad) * w_bytes
                   + 4 * tm * (H_pad + D_pad))
    vmem_limit = int(min(max(2 * vmem_needed, 32 * 1024 * 1024), 64 * 1024 * 1024))

    cost = pl.CostEstimate(
        flops=4 * M_pad * D_pad * H_pad,                       # two matmuls
        transcendentals=M_pad * H_pad,                         # exp inside erf
        bytes_accessed=(n_row_arrays * M_pad * D_pad * act_bytes
                        + (2 * D_pad * H_pad + H_pad + D_pad) * w_bytes),
    )

    out = pl.pallas_call(
        kernel,
        out_shape=jax.ShapeDtypeStruct((M_pad, D_pad), a.dtype),
        grid=grid,
        in_specs=in_specs,
        out_specs=row_spec,
        compiler_params=pltpu.CompilerParams(
            dimension_semantics=("parallel",),
            vmem_limit_bytes=vmem_limit),
        cost_estimate=cost,
    )(*args)
    return out[:M, :D]


def adapter_forward(module_fn, x, params, mode="parallel", tile_m=256):
    """Replicates Adapter.forward(module, input).

    mode='before'  : module(adapter(x) + x)
    mode='after'   : adapter(module(x)) + x
    mode='parallel': module(x) + adapter(x)
    """
    assert mode in ("before", "after", "parallel")
    B, T, D = x.shape
    w1, b1, w2, b2, scale = params
    flat = lambda t: t.reshape(B * T, D)
    unflat = lambda t: t.reshape(B, T, D)

    def run(a, r):  # r=None -> residual is `a` itself (single HBM read of x)
        rf = None if r is None else flat(r)
        return unflat(_adapter_pallas(flat(a), rf, w1, b1, w2, b2, scale, tile_m=tile_m))

    if mode == "before":
        return module_fn(run(x, None))          # module(adapter(x) + x)
    if mode == "after":
        y = module_fn(x)
        return run(y, x)                        # adapter(module(x)) + x
    y = module_fn(x)
    return run(x, y)                            # module(x) + adapter(x)


def _adapter_ref(module_fn, x, params, mode):
    """Pure-JAX reference following the same mixed-precision path."""
    w1, b1, w2, b2, scale = params
    D = x.shape[-1]
    D_pad = w1.shape[0]

    def mlp_f32(t):                              # [B,T,D] -> f32 [B,T,D]
        tp = jnp.pad(t, ((0, 0), (0, 0), (0, D_pad - D))).astype(w1.dtype)
        h = jnp.dot(tp, w1, preferred_element_type=jnp.float32)
        h = _gelu_exact(h + b1[0].astype(jnp.float32))
        y = jnp.dot(h.astype(w2.dtype), w2, preferred_element_type=jnp.float32)
        y = y + b2[0].astype(jnp.float32)
        return (scale[0] * y)[..., :D]

    def run(a, r):
        return (r.astype(jnp.float32) + mlp_f32(a)).astype(a.dtype)

    if mode == "before":
        return module_fn(run(x, x))
    if mode == "after":
        return run(module_fn(x), x)
    return run(x, module_fn(x))


def make_adapter_params(key, embed_dim, hidden_dim, scale=None, dtype=jnp.bfloat16):
    """Shapes match Adapter.__init__ / reset_parameters, pre-padded to lane-dense
    (128-multiple) D/H and pre-transposed to math layout (W1 [D,H], W2 [H,D]).

    PyTorch reset_parameters() zero-inits layer[2] (W2, b2); here we use small
    deterministic random values instead so the kernel output is non-trivial.
    """
    D_pad = _round_up(embed_dim, 128)
    H_pad = _round_up(hidden_dim, 128)
    k1, k2 = jax.random.split(key)
    # kaiming_uniform_(a=sqrt(5)) on a [hidden, embed] weight -> bound = 1/sqrt(embed)
    bound = 1.0 / math.sqrt(embed_dim)
    w1_t = jax.random.uniform(k1, (hidden_dim, embed_dim), jnp.float32, -bound, bound)
    w1 = jnp.zeros((D_pad, H_pad), jnp.float32).at[:embed_dim, :hidden_dim].set(w1_t.T)
    b1 = jnp.zeros((1, H_pad), jnp.float32)
    w2_r = 0.02 * jax.random.normal(k2, (hidden_dim, embed_dim), jnp.float32)
    w2 = jnp.zeros((H_pad, D_pad), jnp.float32).at[:hidden_dim, :embed_dim].set(w2_r)
    b2 = jnp.zeros((1, D_pad), jnp.float32)
    scale_arr = jnp.array([1.0 if scale is None else scale], jnp.float32)  # Scaler
    return (w1.astype(dtype), b1.astype(dtype), w2.astype(dtype), b2.astype(dtype),
            scale_arr)


if __name__ == "__main__":
    key = jax.random.PRNGKey(0)
    kx, kp, km = jax.random.split(key, 3)

    B, T, D = 2, 8, 128         # batch, sequence, embed_dim (lane-dense)
    H = 32                      # hidden_dim (down_sample=0.25 -> int(128*0.25))
    act_dtype = jnp.bfloat16

    x = jax.random.normal(kx, (B, T, D), jnp.float32).astype(act_dtype)
    params = make_adapter_params(kp, D, H, scale=None, dtype=jnp.bfloat16)

    # The wrapped `module` is external to Adapter; model it as a fixed linear map.
    wm = (0.1 * jax.random.normal(km, (D, D), jnp.float32)).astype(act_dtype)
    module_fn = lambda t: jnp.dot(t, wm, preferred_element_type=jnp.float32).astype(t.dtype)

    ok = True
    for mode in ("parallel", "before", "after"):
        out = adapter_forward(module_fn, x, params, mode=mode)
        jax.block_until_ready(out)
        ref = _adapter_ref(module_fn, x, params, mode)
        ok &= bool(jnp.allclose(out.astype(jnp.float32), ref.astype(jnp.float32),
                                atol=5e-2, rtol=5e-2))

    print("KERNEL_OK" if ok else "MISMATCH")
</pallas_src>

<mosaic_0001>
module attributes {stable_mosaic.version = 11 : i64} {
  func.func @_adapter_kernel(%arg0: i32, %arg1: memref<16x128xbf16, #tpu.memory_space<vmem>>, %arg2: memref<16x128xbf16, #tpu.memory_space<vmem>>, %arg3: memref<128x128xbf16, #tpu.memory_space<vmem>>, %arg4: memref<1x128xbf16, #tpu.memory_space<vmem>>, %arg5: memref<128x128xbf16, #tpu.memory_space<vmem>>, %arg6: memref<1x128xbf16, #tpu.memory_space<vmem>>, %arg7: memref<1xf32, #tpu.memory_space<smem>>, %arg8: memref<16x128xbf16, #tpu.memory_space<vmem>>) attributes {dimension_semantics = [#tpu.dimension_semantics<parallel>], iteration_bounds = array<i64: 1>, scalar_prefetch = 0 : i64, scratch_operands = 0 : i64, tpu.core_type = #tpu.core_type<tc>, window_params = [{transform_indices = @transform_0, window_bounds = array<i64: 16, 128>}, {transform_indices = @transform_1, window_bounds = array<i64: 16, 128>}, {pipeline_mode = #tpu.pipeline_mode<synchronous>, transform_indices = @transform_2, window_bounds = array<i64: 128, 128>}, {pipeline_mode = #tpu.pipeline_mode<synchronous>, transform_indices = @transform_3, window_bounds = array<i64: 1, 128>}, {pipeline_mode = #tpu.pipeline_mode<synchronous>, transform_indices = @transform_4, window_bounds = array<i64: 128, 128>}, {pipeline_mode = #tpu.pipeline_mode<synchronous>, transform_indices = @transform_5, window_bounds = array<i64: 1, 128>}, {transform_indices = @transform_6, window_bounds = array<i64: 1>}, {transform_indices = @transform_7, window_bounds = array<i64: 16, 128>}]} {
    %c0 = arith.constant 0 : index
    %c0_0 = arith.constant 0 : index
    %0 = vector.load %arg1[%c0, %c0_0] : memref<16x128xbf16, #tpu.memory_space<vmem>>, vector<16x128xbf16>
    %c0_1 = arith.constant 0 : index
    %c0_2 = arith.constant 0 : index
    %1 = vector.load %arg3[%c0_1, %c0_2] : memref<128x128xbf16, #tpu.memory_space<vmem>>, vector<128x128xbf16>
    %cst = arith.constant dense<0.000000e+00> : vector<16x128xf32>
    %2 = tpu.matmul %0, %1, %cst {dimension_numbers = #tpu.dot_dimension_numbers<[1], [0], [0], [1], [0, 0, 1, 1], [], []>} : vector<16x128xbf16>, vector<128x128xbf16>, vector<16x128xf32> -> vector<16x128xf32>
    %c0_3 = arith.constant 0 : index
    %c0_4 = arith.constant 0 : index
    %3 = vector.load %arg4[%c0_3, %c0_4] : memref<1x128xbf16, #tpu.memory_space<vmem>>, vector<1x128xbf16>
    %4 = arith.extf %3 : vector<1x128xbf16> to vector<1x128xf32>
    %5 = vector.broadcast %4 : vector<1x128xf32> to vector<16x128xf32>
    %6 = arith.addf %2, %5 : vector<16x128xf32>
    %cst_5 = arith.constant 5.000000e-01 : f32
    %7 = vector.broadcast %cst_5 : f32 to vector<16x128xf32>
    %8 = arith.mulf %7, %6 : vector<16x128xf32>
    %cst_6 = arith.constant 0.707106769 : f32
    %9 = vector.broadcast %cst_6 : f32 to vector<16x128xf32>
    %10 = arith.mulf %6, %9 : vector<16x128xf32>
    %11 = math.absf %10 : vector<16x128xf32>
    %cst_7 = arith.constant 0.327591091 : f32
    %12 = vector.broadcast %cst_7 : f32 to vector<16x128xf32>
    %13 = arith.mulf %12, %11 : vector<16x128xf32>
    %cst_8 = arith.constant 1.000000e+00 : f32
    %14 = vector.broadcast %cst_8 : f32 to vector<16x128xf32>
    %15 = arith.addf %14, %13 : vector<16x128xf32>
    %cst_9 = arith.constant 1.000000e+00 : f32
    %16 = vector.broadcast %cst_9 : f32 to vector<16x128xf32>
    %17 = arith.divf %16, %15 : vector<16x128xf32>
    %cst_10 = arith.constant 1.06140542 : f32
    %18 = vector.broadcast %cst_10 : f32 to vector<16x128xf32>
    %19 = arith.mulf %18, %17 : vector<16x128xf32>
    %cst_11 = arith.constant 1.45315206 : f32
    %20 = vector.broadcast %cst_11 : f32 to vector<16x128xf32>
    %21 = arith.subf %19, %20 : vector<16x128xf32>
    %22 = arith.mulf %21, %17 : vector<16x128xf32>
    %cst_12 = arith.constant 1.42141378 : f32
    %23 = vector.broadcast %cst_12 : f32 to vector<16x128xf32>
    %24 = arith.addf %22, %23 : vector<16x128xf32>
    %25 = arith.mulf %24, %17 : vector<16x128xf32>
    %cst_13 = arith.constant 0.284496725 : f32
    %26 = vector.broadcast %cst_13 : f32 to vector<16x128xf32>
    %27 = arith.subf %25, %26 : vector<16x128xf32>
    %28 = arith.mulf %27, %17 : vector<16x128xf32>
    %cst_14 = arith.constant 0.254829586 : f32
    %29 = vector.broadcast %cst_14 : f32 to vector<16x128xf32>
    %30 = arith.addf %28, %29 : vector<16x128xf32>
    %31 = arith.mulf %30, %17 : vector<16x128xf32>
    %cst_15 = arith.constant 0.000000e+00 : f32
    %32 = vector.broadcast %cst_15 : f32 to vector<16x128xf32>
    %33 = arith.subf %32, %11 : vector<16x128xf32>
    %34 = arith.mulf %33, %11 : vector<16x128xf32>
    %35 = math.exp %34 : vector<16x128xf32>
    %36 = arith.mulf %31, %35 : vector<16x128xf32>
    %cst_16 = arith.constant 1.000000e+00 : f32
    %37 = vector.broadcast %cst_16 : f32 to vector<16x128xf32>
    %38 = arith.subf %37, %36 : vector<16x128xf32>
    %cst_17 = arith.constant 0.000000e+00 : f32
    %39 = vector.broadcast %cst_17 : f32 to vector<16x128xf32>
    %40 = arith.cmpf olt, %10, %39 : vector<16x128xf32>
    %cst_18 = arith.constant 0.000000e+00 : f32
    %41 = vector.broadcast %cst_18 : f32 to vector<16x128xf32>
    %42 = arith.subf %41, %38 : vector<16x128xf32>
    %43 = arith.select %40, %42, %38 : vector<16x128xi1>, vector<16x128xf32>
    %cst_19 = arith.constant 1.000000e+00 : f32
    %44 = vector.broadcast %cst_19 : f32 to vector<16x128xf32>
    %45 = arith.addf %44, %43 : vector<16x128xf32>
    %46 = arith.mulf %8, %45 : vector<16x128xf32>
    %47 = arith.truncf %46 : vector<16x128xf32> to vector<16x128xbf16>
    %c0_20 = arith.constant 0 : index
    %c0_21 = arith.constant 0 : index
    %48 = vector.load %arg5[%c0_20, %c0_21] : memref<128x128xbf16, #tpu.memory_space<vmem>>, vector<128x128xbf16>
    %cst_22 = arith.constant dense<0.000000e+00> : vector<16x128xf32>
    %49 = tpu.matmul %47, %48, %cst_22 {dimension_numbers = #tpu.dot_dimension_numbers<[1], [0], [0], [1], [0, 0, 1, 1], [], []>} : vector<16x128xbf16>, vector<128x128xbf16>, vector<16x128xf32> -> vector<16x128xf32>
    %c0_23 = arith.constant 0 : index
    %c0_24 = arith.constant 0 : index
    %50 = vector.load %arg6[%c0_23, %c0_24] : memref<1x128xbf16, #tpu.memory_space<vmem>>, vector<1x128xbf16>
    %51 = arith.extf %50 : vector<1x128xbf16> to vector<1x128xf32>
    %52 = vector.broadcast %51 : vector<1x128xf32> to vector<16x128xf32>
    %53 = arith.addf %49, %52 : vector<16x128xf32>
    %c0_25 = arith.constant 0 : index
    %c0_26 = arith.constant 0 : index
    %54 = vector.load %arg2[%c0_25, %c0_26] : memref<16x128xbf16, #tpu.memory_space<vmem>>, vector<16x128xbf16>
    %55 = arith.extf %54 : vector<16x128xbf16> to vector<16x128xf32>
    %c0_27 = arith.constant 0 : index
    %56 = memref.load %arg7[%c0_27] : memref<1xf32, #tpu.memory_space<smem>>
    %57 = vector.broadcast %56 : f32 to vector<16x128xf32>
    %58 = arith.mulf %57, %53 : vector<16x128xf32>
    %59 = arith.addf %55, %58 : vector<16x128xf32>
    %60 = arith.truncf %59 : vector<16x128xf32> to vector<16x128xbf16>
    %c0_28 = arith.constant 0 : index
    %c0_29 = arith.constant 0 : index
    %61 = vector.load %arg8[%c0_28, %c0_29] : memref<16x128xbf16, #tpu.memory_space<vmem>>, vector<16x128xbf16>
    tpu.vector_store %arg8[%c0_28, %c0_29], %60 {strides = array<i32>} : memref<16x128xbf16, #tpu.memory_space<vmem>>, vector<16x128xbf16>,
    return
  }
  func.func @transform_0(%arg0: i32) -> (i32, i32) {
    %c0_i32 = arith.constant 0 : i32
    %c0_i32_0 = arith.constant 0 : i32
    return %arg0, %c0_i32 : i32, i32
  }
  func.func @transform_1(%arg0: i32) -> (i32, i32) {
    %c0_i32 = arith.constant 0 : i32
    %c0_i32_0 = arith.constant 0 : i32
    return %arg0, %c0_i32 : i32, i32
  }
  func.func @transform_2(%arg0: i32) -> (i32, i32) {
    %c0_i32 = arith.constant 0 : i32
    %c0_i32_0 = arith.constant 0 : i32
    %c0_i32_1 = arith.constant 0 : i32
    return %c0_i32, %c0_i32_0 : i32, i32
  }
  func.func @transform_3(%arg0: i32) -> (i32, i32) {
    %c0_i32 = arith.constant 0 : i32
    %c0_i32_0 = arith.constant 0 : i32
    %c0_i32_1 = arith.constant 0 : i32
    return %c0_i32, %c0_i32_0 : i32, i32
  }
  func.func @transform_4(%arg0: i32) -> (i32, i32) {
    %c0_i32 = arith.constant 0 : i32
    %c0_i32_0 = arith.constant 0 : i32
    %c0_i32_1 = arith.constant 0 : i32
    return %c0_i32, %c0_i32_0 : i32, i32
  }
  func.func @transform_5(%arg0: i32) -> (i32, i32) {
    %c0_i32 = arith.constant 0 : i32
    %c0_i32_0 = arith.constant 0 : i32
    %c0_i32_1 = arith.constant 0 : i32
    return %c0_i32, %c0_i32_0 : i32, i32
  }
  func.func @transform_6(%arg0: i32) -> i32 {
    %c0_i32 = arith.constant 0 : i32
    %c0_i32_0 = arith.constant 0 : i32
    return %c0_i32 : i32
  }
  func.func @transform_7(%arg0: i32) -> (i32, i32) {
    %c0_i32 = arith.constant 0 : i32
    %c0_i32_0 = arith.constant 0 : i32
    return %arg0, %c0_i32 : i32, i32
  }
}

</mosaic_0001>

<bundles_post_ra>
// kernel: tpu_custom_call.1
= control target key start
LH: loop header
LB: loop body
LE: loop exit
PB: predicated region body
PF: predicated region fallthrough
CT: control target
= control target key end

     0   :  { %13 = vsyncpa [#allocation4], 0  ;;  %s806_s0 = inlined_call_operand.hbm [shape: bf16[16,128], index: 0, kind: input, shape index: {}]   ;;  %s807_s1 = inlined_call_operand.hbm [shape: bf16[16,128], index: 1, kind: input, shape index: {}]   ;;  %s808_s2 = inlined_call_operand.hbm [shape: bf16[128,128], index: 2, kind: input, shape index: {}]   ;;  %s809_s3 = inlined_call_operand.vmem [shape: bf16[1,128], index: 3, kind: input, shape index: {}]   ;;  %s810_s4 = inlined_call_operand.hbm [shape: bf16[128,128], index: 4, kind: input, shape index: {}]   ;;  %s811_s5 = inlined_call_operand.vmem [shape: bf16[1,128], index: 5, kind: input, shape index: {}]   ;;  %s812_s6 = inlined_call_operand.<no memory space> [shape: f32[1], index: 6, kind: input, shape index: {}]   ;;  %s813_s7 = inlined_call_operand.hbm [shape: bf16[16,128], index: 7, kind: output, shape index: {}]  }
   0x1   :  { %14 = vsyncpa [#allocation7], 0 }
   0x2   :  { %15 = vsyncpa [#allocation10], 0 }
   0x3   :  { %16 = vsyncpa [#allocation5], 0  ;;  %s652_s24 = smov [#allocation6]   ;;  %s653_s26 = smov [#allocation3]  }
   0x4   :  { %s34_s25 = sshll.u32 %s652_s24, 4  ;;  %s22_s27 = sshll.u32 %s653_s26, 4  ;;  %s35_s25 = int_to_ptr.vmem [resolvable:$true] %s34_s25  ;;  %s701_s27 = int_to_ptr.vmem [resolvable:$true] %s22_s27 }
   0x5   :  { %s534_s30 = scalar_lea.hbm %s807_s1, 128 }
   0x6   :  { %p535_p0 = scmp.ne.s32.totalorder %s807_s1, %s534_s30  ;;  %p538_p1 = scmp.lt.u32.totalorder %s534_s30, %s807_s1 }
   0x8   :  { %p540_p2 = pnand %p538_p1, %p535_p0 }
   0xa   :  { %543 = shalt.err (!%p540_p2)
}
   0xb   :  { %s544_s12 = scalar_lea.vmem %s35_s25, 128  ;;  %p549_p4 = scmp.lt.s32.totalorder %s35_s25, %s35_s25 }
   0xc   :  { %p545_p3 = scmp.ne.s32.totalorder %s35_s25, %s544_s12  ;;  %p550_p5 = scmp.lt.s32.totalorder %s544_s12, %s544_s12 }
   0xe   :  { %p551_p6 = por %p550_p5, %p549_p4 }
  0x10   :  { %p552_p7 = pnand %p551_p6, %p545_p3 }
  0x12   :  { %555 = shalt.err (!%p552_p7)
}
  0x13   :  { %s654_s13 = smov 64   ;;  %s655_s14 = smov 4  }
  0x14   :  { %40 = dma.hbm_to_vmem [thread:$0]  %s807_s1, 128, %s35_s25, [#allocation7], %s654_s13, %s654_s13, %s655_s14  }
  0x15   :  { %s556_s19 = scalar_lea.hbm %s806_s0, 128 }
  0x16   :  { %p557_p8 = scmp.ne.s32.totalorder %s806_s0, %s556_s19  ;;  %p560_p9 = scmp.lt.u32.totalorder %s556_s19, %s806_s0 }
  0x18   :  { %p562_p10 = pnand %p560_p9, %p557_p8 }
  0x1a   :  { %565 = shalt.err (!%p562_p10)
}
  0x1b   :  { %s566_s24 = scalar_lea.vmem %s701_s27, 128  ;;  %p571_p12 = scmp.lt.s32.totalorder %s701_s27, %s701_s27 }
  0x1c   :  { %p567_p11 = scmp.ne.s32.totalorder %s701_s27, %s566_s24  ;;  %p572_p13 = scmp.lt.s32.totalorder %s566_s24, %s566_s24 }
  0x1e   :  { %p573_p0 = por %p572_p13, %p571_p12 }
  0x20   :  { %p574_p1 = pnand %p573_p0, %p567_p11 }
  0x22   :  { %577 = shalt.err (!%p574_p1)
}
  0x23   :  { %28 = dma.hbm_to_vmem [thread:$0]  %s806_s0, 128, %s701_s27, [#allocation4], %s654_s13, %s654_s13, %s655_s14  }
  0x24   :  { %s656_s26 = smov [#allocation8]   ;;  %s657_s29 = smov [#allocation9]  }
  0x25   :  { %s46_s28 = sshll.u32 %s656_s26, 4  ;;  %s60_s30 = sshll.u32 %s657_s29, 4  ;;  %s47_s28 = int_to_ptr.vmem [resolvable:$true] %s46_s28  ;;  %s738_s30 = int_to_ptr.vmem [resolvable:$true] %s60_s30 }
  0x26   :  { %s578_s10 = scalar_lea.hbm %s808_s2, 1024 }
  0x27   :  { %p579_p2 = scmp.ne.s32.totalorder %s808_s2, %s578_s10  ;;  %p582_p3 = scmp.lt.u32.totalorder %s578_s10, %s808_s2 }
  0x29   :  { %p584_p4 = pnand %p582_p3, %p579_p2 }
  0x2b   :  { %587 = shalt.err (!%p584_p4)
}
  0x2c   :  { %s588_s0 = scalar_lea.vmem %s47_s28, 1024  ;;  %p593_p6 = scmp.lt.s32.totalorder %s47_s28, %s47_s28 }
  0x2d   :  { %p589_p5 = scmp.ne.s32.totalorder %s47_s28, %s588_s0  ;;  %p594_p7 = scmp.lt.s32.totalorder %s588_s0, %s588_s0 }
  0x2f   :  { %p595_p8 = por %p594_p7, %p593_p6 }
  0x31   :  { %p596_p9 = pnand %p595_p8, %p589_p5 }
  0x33   :  { %599 = shalt.err (!%p596_p9)
}
  0x34   :  { %52 = dma.hbm_to_vmem [thread:$0]  %s808_s2, 1024, %s47_s28, [#allocation7], %s654_s13, %s654_s13, %s655_s14  }
  0x35   :  { %s600_s20 = scalar_lea.hbm %s810_s4, 1024 }
  0x36   :  { %p601_p10 = scmp.ne.s32.totalorder %s810_s4, %s600_s20  ;;  %p604_p11 = scmp.lt.u32.totalorder %s600_s20, %s810_s4 }
  0x38   :  { %p606_p12 = pnand %p604_p11, %p601_p10 }
  0x3a   :  { %609 = shalt.err (!%p606_p12)
}
  0x3b   :  { %s610_s1 = scalar_lea.vmem %s738_s30, 1024  ;;  %p615_p0 = scmp.lt.s32.totalorder %s738_s30, %s738_s30 }
  0x3c   :  { %p611_p13 = scmp.ne.s32.totalorder %s738_s30, %s610_s1  ;;  %p616_p1 = scmp.lt.s32.totalorder %s610_s1, %s610_s1 }
  0x3e   :  { %p617_p2 = por %p616_p1, %p615_p0 }
  0x40   :  { %p618_p3 = pnand %p617_p2, %p611_p13 }
  0x42   :  { %621 = shalt.err (!%p618_p3)
}
  0x43   :  { %66 = dma.hbm_to_vmem [thread:$0]  %s810_s4, 1024, %s738_s30, [#allocation10], %s654_s13, %s654_s13, %s655_s14  }
  0x44   :  { %644 = dma.done.wait [#allocation4], 128  }
  0x45   :  { %645 = vsyncadd [#allocation4], 4294967168 }
  0x46   :  { %646 = dma.done.wait [#allocation7], 1152  }
  0x47   :  { %647 = vsyncadd [#allocation7], 4294966144 }
  0x48   :  { %648 = dma.done.wait [#allocation10], 1024  }
  0x49   :  { %649 = vsyncadd [#allocation10], 4294966272  ;;  %v658_v0 = vmov 0.0   ;;  %vm659_vm0 = vmmov 0   ;;  %v509_v1 = vld [vmem:[#allocation8] sm:$0xff]   ;;  %v510_v2 = vld [vmem:[#allocation8 + $0x8] sm:$0xff]   ;;  %v104_v18 = vlaneseq }
  0x4a   :  { %460 = vmatprep.subr.bf16.mxu0 %v658_v0  ;;  %476 = vmatprep.mubr.msk.bf16.mxu0 %vm659_vm0, %v658_v0  ;;  %v511_v3 = vld [vmem:[#allocation8 + $0x10] sm:$0xff]   ;;  %v512_v4 = vld [vmem:[#allocation8 + $0x18] sm:$0xff]   ;;  %v513_v5 = vld [vmem:[#allocation8 + $0x20] sm:$0xff]  }
  0x4b   :  { %480 = vmatprep.subr.bf16.mxu1 %v658_v0  ;;  %496 = vmatprep.mubr.msk.bf16.mxu1 %vm659_vm0, %v658_v0  ;;  %v514_v6 = vld [vmem:[#allocation8 + $0x28] sm:$0xff]   ;;  %v515_v7 = vld [vmem:[#allocation8 + $0x30] sm:$0xff]   ;;  %v516_v8 = vld [vmem:[#allocation8 + $0x38] sm:$0xff]   ;;  %v775_v19 = vshrl.u32 %v104_v18, 7 }
  0x4c   :  { %461 = vmatpush3.bf16.msra.mxu0 %v509_v1  ;;  %v517_v9 = vld [vmem:[#allocation3] sm:$0xff]   ;;  %v518_v10 = vld [vmem:[#allocation9] sm:$0xff]   ;;  %v519_v11 = vld [vmem:[#allocation9 + $0x8] sm:$0xff]  }
  0x4d   :  { %462 = vmatprep.subr.bf16.mxu0 %v658_v0  ;;  %481 = vmatpush3.bf16.msra.mxu1 %v518_v10  ;;  %v520_v12 = vld [vmem:[#allocation9 + $0x10] sm:$0xff]   ;;  %v521_v13 = vld [vmem:[#allocation9 + $0x18] sm:$0xff]   ;;  %v522_v14 = vld [vmem:[#allocation9 + $0x20] sm:$0xff]   ;;  %v106_v22 = vsub.s32 0, %v775_v19 }
  0x4e   :  { %482 = vmatprep.subr.bf16.mxu1 %v658_v0  ;;  %v523_v15 = vld [vmem:[#allocation9 + $0x28] sm:$0xff]   ;;  %v524_v16 = vld [vmem:[#allocation9 + $0x30] sm:$0xff]   ;;  %v525_v17 = vld [vmem:[#allocation9 + $0x38] sm:$0xff]  }
  0x4f   :  { %v102_v20 = vld [vmem:[%s809_s3] sm:$0x1] }
  0x50   :  { %463 = vmatpush3.bf16.msra.mxu0 %v510_v2  ;;  %v103_v21 = vunpack.c.l.bf16 %v102_v20 }
  0x51   :  { %464 = vmatprep.subr.bf16.mxu0 %v658_v0  ;;  %483 = vmatpush3.bf16.msra.mxu1 %v519_v11 }
  0x52   :  { %484 = vmatprep.subr.bf16.mxu1 %v658_v0  ;;  %v107_v23 = vrot.slane %v103_v21, %v106_v22 }
  0x54   :  { %465 = vmatpush3.bf16.msra.mxu0 %v511_v3 }
  0x55   :  { %466 = vmatprep.subr.bf16.mxu0 %v658_v0  ;;  %485 = vmatpush3.bf16.msra.mxu1 %v520_v12 }
  0x56   :  { %486 = vmatprep.subr.bf16.mxu1 %v658_v0 }
  0x58   :  { %467 = vmatpush3.bf16.msra.mxu0 %v512_v4 }
  0x59   :  { %468 = vmatprep.subr.bf16.mxu0 %v658_v0  ;;  %487 = vmatpush3.bf16.msra.mxu1 %v521_v13 }
  0x5a   :  { %488 = vmatprep.subr.bf16.mxu1 %v658_v0 }
  0x5c   :  { %469 = vmatpush3.bf16.msra.mxu0 %v513_v5 }
  0x5d   :  { %470 = vmatprep.subr.bf16.mxu0 %v658_v0  ;;  %489 = vmatpush3.bf16.msra.mxu1 %v522_v14 }
  0x5e   :  { %490 = vmatprep.subr.bf16.mxu1 %v658_v0 }
  0x60   :  { %471 = vmatpush3.bf16.msra.mxu0 %v514_v6 }
  0x61   :  { %472 = vmatprep.subr.bf16.mxu0 %v658_v0  ;;  %491 = vmatpush3.bf16.msra.mxu1 %v523_v15 }
  0x62   :  { %492 = vmatprep.subr.bf16.mxu1 %v658_v0 }
  0x64   :  { %473 = vmatpush3.bf16.msra.mxu0 %v515_v7 }
  0x65   :  { %474 = vmatprep.subr.bf16.mxu0 %v658_v0  ;;  %493 = vmatpush3.bf16.msra.mxu1 %v524_v16 }
  0x66   :  { %494 = vmatprep.subr.bf16.mxu1 %v658_v0 }
  0x68   :  { %475 = vmatpush3.bf16.msra.mxu0 %v516_v8 }
  0x69   :  { %495 = vmatpush3.bf16.msra.mxu1 %v525_v17  ;;  %v274_v17 = vld [vmem:[%s811_s5] sm:$0x1]  ;;  %s660_s5 = smov [#allocation11]  }
  0x6a   :  { %v275_v18 = vunpack.c.l.bf16 %v274_v17  ;;  %s394_s8 = sshll.u32 %s660_s5, 4  ;;  %s395_s8 = int_to_ptr.vmem [resolvable:$true] %s394_s8 }
  0x6b   :  { %477 = vmatmul.mubr.bf16.vlgmr.msra.gmra.mrb[0].mxu0 %v517_v9  ;;  %s622_s9 = scalar_lea.vmem %s395_s8, 128  ;;  %p627_p5 = scmp.lt.s32.totalorder %s395_s8, %s395_s8 }
  0x6c   :  { %v279_v20 = vrot.slane %v275_v18, %v106_v22  ;;  %p623_p4 = scmp.ne.s32.totalorder %s395_s8, %s622_s9  ;;  %p628_p6 = scmp.lt.s32.totalorder %s622_s9, %s622_s9 }
  0x6e   :  { %p629_p7 = por %p628_p6, %p627_p5 }
  0x70   :  { %p630_p8 = pnand %p629_p7, %p623_p4 }
 0x13e   :  { %v196_v24 = vpop.f32.mrb[0].mxu0 }
 0x13f   :  { %v197_v25 = vadd.f32 %v196_v24, %v107_v23  ;;  %v478_v26 = vpop.f32.mrb[1].mxu0  ;;  %v374_v24 = vstv %s812_s6 }
 0x140   :  { %v199_v27 = vpop.f32.mrb[2].mxu0 }
 0x141   :  { %v205_v28 = vmul.f32 0.70710677, %v197_v25  ;;  %v200_v29 = vadd.f32 %v199_v27, %v107_v23  ;;  %v479_v30 = vpop.f32.mrb[3].mxu0  ;;  %v203_v11 = vmul.f32 0.5, %v197_v25  ;;  %v434_v23 = vld [vmem:[#allocation6] sm:$0xff]  }
 0x143   :  { %v207_v31 = vand.u32 2147483647, %v205_v28  ;;  %v206_v32 = vmul.f32 0.70710677, %v200_v29  ;;  %vm247_vm1 = vcmp.lt.f32.partialorder %v205_v28, 0.0  ;;  %v204_v12 = vmul.f32 0.5, %v200_v29 }
 0x144   :  { %v435_v28 = vunpack.c.l.bf16 %v434_v23 }
 0x145   :  { %v209_v33 = vmul.f32 0.3275911, %v207_v31  ;;  %v208_v34 = vand.u32 2147483647, %v206_v32  ;;  %v235_v38 = vsub.f32 0.0, %v207_v31  ;;  %vm248_vm2 = vcmp.lt.f32.partialorder %v206_v32, 0.0 }
 0x147   :  { %v211_v35 = vadd.f32 1.0, %v209_v33  ;;  %v210_v36 = vmul.f32 0.3275911, %v208_v34  ;;  %v236_v39 = vsub.f32 0.0, %v208_v34  ;;  %v237_v41 = vmul.f32 %v235_v38, %v207_v31 }
 0x148   :  { %v436_v31 = vunpack.c.h.bf16 %v434_v23 }
 0x149   :  { %526 = vrcp.f32 %v211_v35  ;;  %v212_v37 = vadd.f32 1.0, %v210_v36  ;;  %v238_v45 = vmul.f32 %v236_v39, %v208_v34  ;;  %v239_v46 = vmul.f32 1.442695, %v237_v41 }
 0x14b   :  { %528 = vrcp.f32 %v212_v37  ;;  %v241_v51 = vmul.f32 1.442695, %v238_v45 }
 0x14c   :  { %530 = vpow2.f32 %v239_v46 }
 0x14d   :  { %532 = vpow2.f32 %v241_v51 }
 0x153   :  { %v527_v40 = vpop.eup %526 }
 0x154   :  { %v217_v42 = vmul.f32 1.0614054, %v527_v40 }
 0x155   :  { %v529_v43 = vpop.eup %528 }
 0x156   :  { %v417_v44 = vadd.f32 -1.4531521, %v217_v42  ;;  %v218_v47 = vmul.f32 1.0614054, %v529_v43  ;;  %v531_v62 = vpop.eup %530 }
 0x157   :  { %v533_v2 = vpop.eup %532 }
 0x158   :  { %v221_v48 = vmul.f32 %v527_v40, %v417_v44  ;;  %v418_v49 = vadd.f32 -1.4531521, %v218_v47 }
 0x15a   :  { %v223_v50 = vadd.f32 1.4214138, %v221_v48  ;;  %v222_v52 = vmul.f32 %v529_v43, %v418_v49 }
 0x15c   :  { %v225_v53 = vmul.f32 %v527_v40, %v223_v50  ;;  %v224_v54 = vadd.f32 1.4214138, %v222_v52 }
 0x15e   :  { %v419_v55 = vadd.f32 -0.28449672, %v225_v53  ;;  %v226_v56 = vmul.f32 %v529_v43, %v224_v54 }
 0x160   :  { %v229_v57 = vmul.f32 %v527_v40, %v419_v55  ;;  %v420_v58 = vadd.f32 -0.28449672, %v226_v56 }
 0x162   :  { %v231_v59 = vadd.f32 0.2548296, %v229_v57  ;;  %v230_v60 = vmul.f32 %v529_v43, %v420_v58 }
 0x164   :  { %v233_v61 = vmul.f32 %v527_v40, %v231_v59  ;;  %v232_v63 = vadd.f32 0.2548296, %v230_v60 }
 0x166   :  { %v243_v0 = vmul.f32 %v531_v62, %v233_v61  ;;  %v234_v1 = vmul.f32 %v529_v43, %v232_v63 }
 0x168   :  { %v245_v3 = vsub.f32 1.0, %v243_v0  ;;  %v244_v4 = vmul.f32 %v533_v2, %v234_v1 }
 0x16a   :  { %v249_v5 = vsub.f32 0.0, %v245_v3  ;;  %v246_v6 = vsub.f32 1.0, %v244_v4 }
 0x16c   :  { %v251_v7 = vsel %vm247_vm1, %v249_v5, %v245_v3  ;;  %v250_v8 = vsub.f32 0.0, %v246_v6 }
 0x16d   :  { %v253_v9 = vadd.f32 1.0, %v251_v7 }
 0x16e   :  { %v252_v10 = vsel %vm248_vm2, %v250_v8, %v246_v6 }
 0x16f   :  { %v254_v13 = vadd.f32 1.0, %v252_v10  ;;  %v255_v14 = vmul.f32 %v253_v9, %v203_v11 }
 0x171   :  { %v256_v15 = vmul.f32 %v254_v13, %v204_v12 }
 0x173   :  { %v257_v16 = vpack.c.bf16 %v256_v15, %v255_v14 }
 0x175   :  { %497 = vmatmul.mubr.bf16.vlgmr.msra.gmra.mrb[0].mxu1 %v257_v16 }
 0x248   :  { %v362_v21 = vpop.f32.mrb[0].mxu1 }
 0x249   :  { %v363_v25 = vadd.f32 %v362_v21, %v279_v20  ;;  %v498_v26 = vpop.f32.mrb[1].mxu1 }
 0x24a   :  { %v365_v27 = vpop.f32.mrb[2].mxu1 }
 0x24b   :  { %v375_v29 = vmul.f32 %v374_v24, %v363_v25  ;;  %v366_v30 = vadd.f32 %v365_v27, %v279_v20  ;;  %v499_v32 = vpop.f32.mrb[3].mxu1 }
 0x24d   :  { %v376_v33 = vmul.f32 %v374_v24, %v366_v30  ;;  %v377_v34 = vadd.f32 %v435_v28, %v375_v29 }
 0x24f   :  { %v378_v19 = vadd.f32 %v436_v31, %v376_v33 }
 0x251   :  { %v440_v22 = vpack.c.bf16 %v378_v19, %v377_v34 }
 0x253   :  { %441 = vst [vmem:[#allocation11] sm:$0xff] %v440_v22  }
 0x254   :  { %633 = shalt.err (!%p630_p8)
}
 0x255   :  { %s634_s11 = scalar_lea.hbm %s813_s7, 128 }
 0x256   :  { %p635_p9 = scmp.ne.s32.totalorder %s813_s7, %s634_s11  ;;  %p638_p10 = scmp.lt.u32.totalorder %s634_s11, %s813_s7 }
 0x258   :  { %p640_p11 = pnand %p638_p10, %p635_p9 }
 0x25a   :  { %643 = shalt.err (!%p640_p11)
}
 0x25b   :  { %400 = dma.vmem_to_hbm [thread:$0]  %s395_s8, 128, %s813_s7, [#allocation5], %s654_s13, %s654_s13, %s655_s14  }
 0x25c   :  { %650 = dma.done.wait [#allocation5], 128  }
 0x25d   :  { %651 = vsyncadd [#allocation5], 4294967168 }
 0x25e   :  { %404 = vsyncpa [#allocation4], 1 }
 0x25f   :  { %405 = vsyncpa [#allocation7], 1 }
 0x260   :  { %406 = vsyncpa [#allocation10], 1 }
 0x261   :  { %407 = vsyncpa [#allocation5], 1 }

</bundles_post_ra>
